<compile_context>
chip_gen: v7x
topology: tpu7x:2x2x1
jax: 0.10.0
libtpu: 0.0.40
codegen_flags: <defaults>
</compile_context>

<pallas_src>
import jax
import jax.numpy as jnp
from jax.experimental import pallas as pl
from jax.experimental.pallas import tpu as pltpu


def qnet_kernel(x_ref, w1_ref, w2_ref, o_ref):
    # x_ref:  [TB, S+1]    last column is the constant 1 (fc1 bias source)
    # w1_ref: [S+1, H+1]   [[w1, 0], [b1, 1]]  -> hidden column H is always 1
    # w2_ref: [H+1, Npad]  [[w2], [b2]] lane-padded; padded-column bias = -1e30
    # o_ref:  [TB, Npad]   lane-dense store; columns >= action_dim are junk
    h = jnp.maximum(
        jnp.dot(x_ref[...], w1_ref[...], preferred_element_type=jnp.float32),
        0.0,
    )
    o_ref[...] = jnp.dot(
        h, w2_ref[...], preferred_element_type=jnp.float32
    ).astype(o_ref.dtype)


def prepare_qnet_params(w1, b1, w2, b2, *, pad_bias=-1e30):
    """Fold biases into augmented weights.  Call ONCE per parameter update.

    w1: [S, H], b1: [H], w2: [H, A], b2: [A]
      -> w1aug [S+1, H+1], w2aug [H+1, Npad]   with Npad = round_up(A, 128).
    """
    S, H = w1.shape
    H2, A = w2.shape
    assert H2 == H and b1.shape == (H,) and b2.shape == (A,)
    npad = ((A + 127) // 128) * 128

    w1aug = jnp.zeros((S + 1, H + 1), w1.dtype)
    w1aug = w1aug.at[:S, :H].set(w1)
    w1aug = w1aug.at[S, :H].set(b1)
    w1aug = w1aug.at[S, H].set(1.0)  # keeps the ones-column alive through fc1

    w2aug = jnp.zeros((H + 1, npad), w2.dtype)
    w2aug = w2aug.at[:H, :A].set(w2)
    w2aug = w2aug.at[H, :A].set(b2)
    # Padded action columns: zero weights + very negative bias so an argmax
    # over the unsliced padded buffer can never select a padded column.
    w2aug = w2aug.at[H, A:].set(pad_bias)
    return w1aug, w2aug


def _tensorcores_per_chip():
    # v7x has 2 TensorCores per chip; v5e/v6e have 1.  Fall back to 1 if the
    # runtime does not report it.  (On v7x, verify with a trace that
    # dimension_semantics=("parallel",) actually shards the grid across TCs.)
    try:
        return max(1, int(getattr(jax.devices()[0], "num_cores", 1)))
    except Exception:
        return 1


def _pick_block_b(batch, target_blocks, max_tb):
    """Batch tile aiming for `target_blocks` grid steps, 8-sublane aligned."""
    if batch <= 8:
        return batch  # single block equal to the full batch dim
    tb = pl.cdiv(batch, max(1, target_blocks))
    tb = min(max(tb, 8), max_tb)
    return ((tb + 7) // 8) * 8


def qnet_apply(x, w1aug, w2aug, action_dim, *, max_tb=8192, grid_parallel=None):
    """Fused fc2(relu(fc1(x))).  x: [B, S] -> [B, action_dim]."""
    B, S = x.shape
    assert w1aug.shape[0] == S + 1
    assert w2aug.shape[0] == w1aug.shape[1]
    npad = w2aug.shape[1]

    # fc1 bias enters through an appended ones column (free in VMEM: the
    # S+1 lanes pad to 128 regardless).
    x_aug = jnp.concatenate([x, jnp.ones((B, 1), x.dtype)], axis=1)

    if grid_parallel is None:
        grid_parallel = _tensorcores_per_chip()
    tb = _pick_block_b(B, grid_parallel, max_tb)
    grid = (pl.cdiv(B, tb),)  # ragged edge block is masked by Pallas

    out = pl.pallas_call(
        qnet_kernel,
        out_shape=jax.ShapeDtypeStruct((B, npad), x.dtype),
        grid=grid,
        in_specs=[
            pl.BlockSpec((tb, S + 1), lambda i: (i, 0)),   # batch tile
            pl.BlockSpec(w1aug.shape, lambda i: (0, 0)),   # resident weights
            pl.BlockSpec(w2aug.shape, lambda i: (0, 0)),   # resident weights
        ],
        out_specs=pl.BlockSpec((tb, npad), lambda i: (i, 0)),
        compiler_params=pltpu.CompilerParams(
            dimension_semantics=("parallel",),        # megacore / v7x 2-TC shard
            vmem_limit_bytes=32 * 1024 * 1024,        # covers tb=8192 on v5e
        ),
    )(x_aug, w1aug, w2aug)

    # TODO(synk): for huge replay batches, fuse the consumer's max/argmax into
    # the kernel instead of writing + re-slicing the 128-lane-padded buffer.
    return out[:, :action_dim]


def qnet_forward(x, w1, b1, w2, b2, **kwargs):
    """Compatibility wrapper matching the original PyTorch Qnet.forward.

    In a real DQN loop, call prepare_qnet_params() once per parameter update
    and qnet_apply() per forward; folding here per-call re-adds the XLA ops
    the perf review asked to hoist.
    """
    w1aug, w2aug = prepare_qnet_params(w1, b1, w2, b2)
    return qnet_apply(x, w1aug, w2aug, w2.shape[1], **kwargs)


if __name__ == "__main__":
    # Small shapes consistent with a DQN Qnet: state_dim=4, hidden=32, action=2
    batch, state_dim, hidden_dim, action_dim = 2, 4, 32, 2

    key = jax.random.PRNGKey(0)
    kx, kw1, kb1, kw2, kb2 = jax.random.split(key, 5)

    x = jax.random.normal(kx, (batch, state_dim), dtype=jnp.float32)
    w1 = jax.random.uniform(kw1, (state_dim, hidden_dim), jnp.float32, -0.5, 0.5)
    b1 = jax.random.uniform(kb1, (hidden_dim,), jnp.float32, -0.5, 0.5)
    w2 = jax.random.uniform(kw2, (hidden_dim, action_dim), jnp.float32, -0.5, 0.5)
    b2 = jax.random.uniform(kb2, (action_dim,), jnp.float32, -0.5, 0.5)

    # Parameter prep is hoisted: once per parameter update.
    w1aug, w2aug = prepare_qnet_params(w1, b1, w2, b2)
    jax.block_until_ready((w1aug, w2aug))

    ref = jnp.maximum(x @ w1 + b1, 0.0) @ w2 + b2

    out = qnet_apply(x, w1aug, w2aug, action_dim)
    jax.block_until_ready(out)
    assert out.shape == (batch, action_dim)
    assert jnp.allclose(out, ref, atol=1e-5, rtol=1e-5)

    # Replay-buffer-sized batch, deliberately not tile-aligned so the ragged
    # (masked) edge block is exercised; force the two-tile (v7x-style) grid.
    big_b = 1000
    xb = jax.random.normal(kx, (big_b, state_dim), dtype=jnp.float32)
    out_b = qnet_apply(xb, w1aug, w2aug, action_dim, grid_parallel=2)
    jax.block_until_ready(out_b)
    ref_b = jnp.maximum(xb @ w1 + b1, 0.0) @ w2 + b2
    assert out_b.shape == (big_b, action_dim)
    assert jnp.allclose(out_b, ref_b, atol=1e-5, rtol=1e-5)

    # Compatibility wrapper (per-call fold) still matches the reference.
    out_c = qnet_forward(x, w1, b1, w2, b2)
    jax.block_until_ready(out_c)
    assert jnp.allclose(out_c, ref, atol=1e-5, rtol=1e-5)

    print("KERNEL_OK")
</pallas_src>

<mosaic_0001>
module attributes {stable_mosaic.version = 11 : i64} {
  func.func @qnet_kernel(%arg0: i32, %arg1: memref<2x5xf32, #tpu.memory_space<vmem>>, %arg2: memref<5x33xf32, #tpu.memory_space<vmem>>, %arg3: memref<33x128xf32, #tpu.memory_space<vmem>>, %arg4: memref<2x128xf32, #tpu.memory_space<vmem>>) attributes {dimension_semantics = [#tpu.dimension_semantics<parallel>], iteration_bounds = array<i64: 1>, scalar_prefetch = 0 : i64, scratch_operands = 0 : i64, tpu.core_type = #tpu.core_type<tc>, window_params = [{transform_indices = @transform_0, window_bounds = array<i64: 2, 5>}, {pipeline_mode = #tpu.pipeline_mode<synchronous>, transform_indices = @transform_1, window_bounds = array<i64: 5, 33>}, {pipeline_mode = #tpu.pipeline_mode<synchronous>, transform_indices = @transform_2, window_bounds = array<i64: 33, 128>}, {transform_indices = @transform_3, window_bounds = array<i64: 2, 128>}]} {
    %c0 = arith.constant 0 : index
    %c0_0 = arith.constant 0 : index
    %0 = vector.load %arg1[%c0, %c0_0] : memref<2x5xf32, #tpu.memory_space<vmem>>, vector<2x5xf32>
    %c0_1 = arith.constant 0 : index
    %c0_2 = arith.constant 0 : index
    %1 = vector.load %arg2[%c0_1, %c0_2] : memref<5x33xf32, #tpu.memory_space<vmem>>, vector<5x33xf32>
    %cst = arith.constant dense<0.000000e+00> : vector<2x33xf32>
    %2 = tpu.matmul %0, %1, %cst {dimension_numbers = #tpu.dot_dimension_numbers<[1], [0], [0], [1], [0, 0, 1, 1], [], []>} : vector<2x5xf32>, vector<5x33xf32>, vector<2x33xf32> -> vector<2x33xf32>
    %cst_3 = arith.constant 0.000000e+00 : f32
    %3 = vector.broadcast %cst_3 : f32 to vector<2x33xf32>
    %4 = arith.maximumf %2, %3 : vector<2x33xf32>
    %c0_4 = arith.constant 0 : index
    %c0_5 = arith.constant 0 : index
    %5 = vector.load %arg3[%c0_4, %c0_5] : memref<33x128xf32, #tpu.memory_space<vmem>>, vector<33x128xf32>
    %cst_6 = arith.constant dense<0.000000e+00> : vector<2x128xf32>
    %6 = tpu.matmul %4, %5, %cst_6 {dimension_numbers = #tpu.dot_dimension_numbers<[1], [0], [0], [1], [0, 0, 1, 1], [], []>} : vector<2x33xf32>, vector<33x128xf32>, vector<2x128xf32> -> vector<2x128xf32>
    %c0_7 = arith.constant 0 : index
    %c0_8 = arith.constant 0 : index
    %7 = vector.load %arg4[%c0_7, %c0_8] : memref<2x128xf32, #tpu.memory_space<vmem>>, vector<2x128xf32>
    tpu.vector_store %arg4[%c0_7, %c0_8], %6 {strides = array<i32>} : memref<2x128xf32, #tpu.memory_space<vmem>>, vector<2x128xf32>,
    return
  }
  func.func @transform_0(%arg0: i32) -> (i32, i32) {
    %c0_i32 = arith.constant 0 : i32
    %c0_i32_0 = arith.constant 0 : i32
    return %arg0, %c0_i32 : i32, i32
  }
  func.func @transform_1(%arg0: i32) -> (i32, i32) {
    %c0_i32 = arith.constant 0 : i32
    %c0_i32_0 = arith.constant 0 : i32
    %c0_i32_1 = arith.constant 0 : i32
    return %c0_i32, %c0_i32_0 : i32, i32
  }
  func.func @transform_2(%arg0: i32) -> (i32, i32) {
    %c0_i32 = arith.constant 0 : i32
    %c0_i32_0 = arith.constant 0 : i32
    %c0_i32_1 = arith.constant 0 : i32
    return %c0_i32, %c0_i32_0 : i32, i32
  }
  func.func @transform_3(%arg0: i32) -> (i32, i32) {
    %c0_i32 = arith.constant 0 : i32
    %c0_i32_0 = arith.constant 0 : i32
    return %arg0, %c0_i32 : i32, i32
  }
}

</mosaic_0001>

<bundles_post_ra>
// kernel: tpu_custom_call.1
= control target key start
LH: loop header
LB: loop body
LE: loop exit
PB: predicated region body
PF: predicated region fallthrough
CT: control target
= control target key end

     0   :  { %8 = vsyncpa [#allocation3], 0  ;;  %s449_s0 = inlined_call_operand.hbm [shape: f32[2,5], index: 0, kind: input, shape index: {}]   ;;  %s450_s1 = inlined_call_operand.hbm [shape: f32[5,33], index: 1, kind: input, shape index: {}]   ;;  %s451_s2 = inlined_call_operand.hbm [shape: f32[33,128], index: 2, kind: input, shape index: {}]   ;;  %s452_s3 = inlined_call_operand.hbm [shape: f32[2,128], index: 3, kind: output, shape index: {}]  }
   0x1   :  { %9 = vsyncpa [#allocation6], 0 }
   0x2   :  { %10 = vsyncpa [#allocation4], 0  ;;  %s372_s12 = smov [#allocation5]   ;;  %s373_s14 = smov [#allocation2]  }
   0x3   :  { %s27_s13 = sshll.u32 %s372_s12, 4  ;;  %s17_s15 = sshll.u32 %s373_s14, 4  ;;  %s28_s13 = int_to_ptr.vmem [resolvable:$true] %s27_s13  ;;  %s18_s15 = int_to_ptr.vmem [resolvable:$true] %s17_s15 }
   0x4   :  { %s278_s18 = scalar_lea.hbm %s450_s1, 128 }
   0x5   :  { %p279_p0 = scmp.ne.s32.totalorder %s450_s1, %s278_s18  ;;  %p282_p1 = scmp.lt.u32.totalorder %s278_s18, %s450_s1 }
   0x7   :  { %p284_p2 = pnand %p282_p1, %p279_p0 }
   0x9   :  { %287 = shalt.err (!%p284_p2)
}
   0xa   :  { %s288_s23 = scalar_lea.vmem %s28_s13, 128  ;;  %p293_p4 = scmp.lt.s32.totalorder %s28_s13, %s28_s13 }
   0xb   :  { %p289_p3 = scmp.ne.s32.totalorder %s28_s13, %s288_s23  ;;  %p294_p5 = scmp.lt.s32.totalorder %s288_s23, %s288_s23 }
   0xd   :  { %p295_p6 = por %p294_p5, %p293_p4 }
   0xf   :  { %p296_p7 = pnand %p295_p6, %p289_p3 }
  0x11   :  { %299 = shalt.err (!%p296_p7)
}
  0x12   :  { %30 = dma.hbm_to_vmem [thread:$0]  %s450_s1, 128, %s28_s13, [#allocation6]  }
  0x13   :  { %s300_s28 = scalar_lea.hbm %s449_s0, 32 }
  0x14   :  { %p301_p8 = scmp.ne.s32.totalorder %s449_s0, %s300_s28  ;;  %p304_p9 = scmp.lt.u32.totalorder %s300_s28, %s449_s0 }
  0x16   :  { %p306_p10 = pnand %p304_p9, %p301_p8 }
  0x18   :  { %309 = shalt.err (!%p306_p10)
}
  0x19   :  { %s310_s6 = scalar_lea.vmem %s18_s15, 32  ;;  %p315_p12 = scmp.lt.s32.totalorder %s18_s15, %s18_s15 }
  0x1a   :  { %p311_p11 = scmp.ne.s32.totalorder %s18_s15, %s310_s6  ;;  %p316_p13 = scmp.lt.s32.totalorder %s310_s6, %s310_s6 }
  0x1c   :  { %p317_p0 = por %p316_p13, %p315_p12 }
  0x1e   :  { %p318_p1 = pnand %p317_p0, %p311_p11 }
  0x20   :  { %321 = shalt.err (!%p318_p1)
}
  0x21   :  { %20 = dma.hbm_to_vmem [thread:$0]  %s449_s0, 32, %s18_s15, [#allocation3]  }
  0x22   :  { %s374_s8 = smov [#allocation7]   ;;  %s322_s12 = scalar_lea.hbm %s451_s2, 640 }
  0x23   :  { %s36_s9 = sshll.u32 %s374_s8, 4  ;;  %p323_p2 = scmp.ne.s32.totalorder %s451_s2, %s322_s12  ;;  %s37_s9 = int_to_ptr.vmem [resolvable:$true] %s36_s9 }
  0x24   :  { %p326_p3 = scmp.lt.u32.totalorder %s322_s12, %s451_s2 }
  0x26   :  { %p328_p4 = pnand %p326_p3, %p323_p2 }
  0x28   :  { %331 = shalt.err (!%p328_p4)
}
  0x29   :  { %s332_s18 = scalar_lea.vmem %s37_s9, 640  ;;  %p337_p6 = scmp.lt.s32.totalorder %s37_s9, %s37_s9 }
  0x2a   :  { %p333_p5 = scmp.ne.s32.totalorder %s37_s9, %s332_s18  ;;  %p338_p7 = scmp.lt.s32.totalorder %s332_s18, %s332_s18 }
  0x2c   :  { %p339_p8 = por %p338_p7, %p337_p6 }
  0x2e   :  { %p340_p9 = pnand %p339_p8, %p333_p5 }
  0x30   :  { %343 = shalt.err (!%p340_p9)
}
  0x31   :  { %s375_s0 = smov 128   ;;  %s376_s15 = smov 8  }
  0x32   :  { %42 = dma.hbm_to_vmem [thread:$0]  %s451_s2, 640, %s37_s9, [#allocation6], %s375_s0, %s375_s0, %s376_s15  }
  0x33   :  { %366 = dma.done.wait [#allocation3], 32  }
  0x34   :  { %367 = vsyncadd [#allocation3], 4294967264 }
  0x35   :  { %368 = dma.done.wait [#allocation6], 768  }
  0x36   :  { %369 = vsyncadd [#allocation6], 4294966528  ;;  %v377_v0 = vmov 0.0   ;;  %vm378_vm0 = vmmov 0   ;;  %v379_v1 = vmov 0.0|0.0   ;;  %vm58_vm1 = vcmask 1044480  }
  0x37   :  { %245 = vmatprep.subr.mxu0 %v377_v0  ;;  %247 = vmatprep.mubr.msk.f32.mxu0 %vm378_vm0, %v377_v0  ;;  %vm54_vm2 = vcmask 39936   ;;  %v53_v2 = vld [vmem:[#allocation5] sm:$0x1f]  ;;  %v52_v3 = vld [vmem:[#allocation2] sm:$0x3]  ;;  %v133_v4 = vld [vmem:[#allocation7] sm:$0xff] }
  0x38   :  { %263 = vmatprep.subr.bf16.mxu1 %v379_v1  ;;  %260 = vmatprep.mubr.msk.f32.mxu1 %vm378_vm0, %v377_v0  ;;  %v134_v5 = vld [vmem:[#allocation7 + $0x8] sm:$0xff]  ;;  %v135_v6 = vld [vmem:[#allocation7 + $0x10] sm:$0xff]  ;;  %v136_v7 = vld [vmem:[#allocation7 + $0x18] sm:$0xff]  ;;  %vm142_vm3 = vcmask 1040384   ;;  %vm138_vm4 = vcmask 269312   ;;  %s380_s2 = smov [#allocation8]  }
  0x39   :  { %246 = vmatpush3.msk.msra.mxu0 %vm58_vm1, %v53_v2  ;;  %v264_v8 = vpack.c.bf16 %v134_v5, %v133_v4  ;;  %v267_v9 = vpack.c.bf16 %v136_v7, %v135_v6  ;;  %v137_v10 = vld [vmem:[#allocation7 + $0x20] sm:$0x1]  ;;  %s223_s21 = sshll.u32 %s380_s2, 4  ;;  %s224_s21 = int_to_ptr.vmem [resolvable:$true] %s223_s21 }
  0x3a   :  { %248 = vmatmul.mubr.msk.f32.vlgmr.msra.gmra.mrb[0].mxu0 %vm54_vm2, %v52_v3  ;;  %s344_s22 = scalar_lea.vmem %s224_s21, 32  ;;  %p349_p11 = scmp.lt.s32.totalorder %s224_s21, %s224_s21 }
  0x3b   :  { %265 = vmatpush3.bf16.msra.mxu1 %v264_v8  ;;  %p345_p10 = scmp.ne.s32.totalorder %s224_s21, %s344_s22  ;;  %p350_p12 = scmp.lt.s32.totalorder %s344_s22, %s344_s22 }
  0x3c   :  { %266 = vmatprep.subr.bf16.mxu1 %v379_v1 }
  0x3d   :  { %p351_p13 = por %p350_p12, %p349_p11 }
  0x3f   :  { %268 = vmatpush3.bf16.msra.mxu1 %v267_v9  ;;  %p352_p0 = pnand %p351_p13, %p345_p10 }
  0x40   :  { %258 = vmatprep.subr.mxu1 %v377_v0 }
  0x43   :  { %259 = vmatpush3.msk.msra.mxu1 %vm142_vm3, %v137_v10 }
 0x10d   :  { %v128_v11 = vpop.f32.mrb[0].mxu0 }
 0x10e   :  { %v132_v12 = vmax.f32 %v128_v11, 0.0  ;;  %v249_v13 = vpop.f32.mrb[1].mxu0 }
 0x110   :  { %261 = vmatmul.mubr.msk.f32.vlgmr.msra.gmra.mrb[0].mxu1 %vm138_vm4, %v132_v12 }
 0x1e3   :  { %v212_v14 = vpop.f32.mrb[0].mxu1 }
 0x1e4   :  { %216 = vst [vmem:[#allocation8] sm:$0x3] %v212_v14  ;;  %v262_v15 = vpop.f32.mrb[1].mxu1 }
 0x1e5   :  { %355 = shalt.err (!%p352_p0)
}
 0x1e6   :  { %s356_s25 = scalar_lea.hbm %s452_s3, 32 }
 0x1e7   :  { %p357_p1 = scmp.ne.s32.totalorder %s452_s3, %s356_s25  ;;  %p360_p2 = scmp.lt.u32.totalorder %s356_s25, %s452_s3 }
 0x1e9   :  { %p362_p3 = pnand %p360_p2, %p357_p1 }
 0x1eb   :  { %365 = shalt.err (!%p362_p3)
}
 0x1ec   :  { %226 = dma.vmem_to_hbm [thread:$0]  %s224_s21, 32, %s452_s3, [#allocation4]  }
 0x1ed   :  { %370 = dma.done.wait [#allocation4], 32  }
 0x1ee   :  { %371 = vsyncadd [#allocation4], 4294967264 }
 0x1ef   :  { %230 = vsyncpa [#allocation3], 1 }
 0x1f0   :  { %231 = vsyncpa [#allocation6], 1 }
 0x1f1   :  { %232 = vsyncpa [#allocation4], 1 }

</bundles_post_ra>
